<compile_context>
chip_gen: v6e
topology: v6e:2x2x1
jax: 0.10.0
libtpu: 0.0.40
codegen_flags: <defaults>
</compile_context>

<pallas_src>
import functools

import jax
import jax.numpy as jnp
from jax.experimental import pallas as pl
from jax.experimental.pallas import tpu as pltpu


def _mha_csra_fused_kernel(x_ref, w_ref, t_ref, out_ref, *, num_heads):
    """All CSRA heads in one shot.

    x_ref:   (B, C, L)   activations, L = H*W on the lane axis
    w_ref:   (M, C)      stacked 1x1-conv weights, M = num_heads * num_classes
    t_ref:   (1, M)      per-row temperature (head temperature repeated per class)
    out_ref: (B, N)      sum over heads of the per-head attention logits
    """
    x = x_ref[...]                                   # (B, C, L)
    w = w_ref[...]                                   # (M, C)
    t = t_ref[...]                                   # (1, M)

    B = x.shape[0]
    M = w.shape[0]
    N = M // num_heads

    # One fused 1x1-conv for every head: (B, M, C) @ (B, C, L) -> (B, M, L).
    # NOTE: for realistic backbones (C ~ 2048) cast x/w to bf16 here and keep
    # the f32 accumulation; at C=4 we stay in f32 so the 1e-4 check holds.
    w_b = jnp.broadcast_to(w[None, :, :], (B, M, w.shape[1]))
    score = jnp.einsum('bmc,bcl->bml', w_b, x,
                       preferred_element_type=jnp.float32)     # (B, M, L)

    # T == 99 heads: plain max over the spatial (lane) axis.
    max_logit = jnp.max(score, axis=-1)                        # (B, M)

    # Other heads: softmax(score * T) over spatial, then sum(score * soft).
    s = score * t[:, :, None]                                  # (B, M, L)
    m = jnp.max(s, axis=-1, keepdims=True)                     # (B, M, 1)
    p = jnp.exp(s - m)                                         # (B, M, L)
    denom = jnp.sum(p, axis=-1)                                # (B, M)
    soft_sum = jnp.sum(score * p, axis=-1) / denom             # (B, M)

    att = jnp.where(t == 99.0, max_logit, soft_sum)            # (B, M)

    # Sum per-head partials (rows are head-major): single final store.
    logit = att[:, 0:N]
    for h in range(1, num_heads):
        logit = logit + att[:, h * N:(h + 1) * N]
    out_ref[...] = logit.astype(out_ref.dtype)


def mha_forward(x_nchw, w_conv, temps):
    """x_nchw: (B, C, H, W); w_conv: (num_heads, N, C) 1x1-conv weights
    (PyTorch nn.Conv2d weight (N, C, 1, 1) per head, squeezed); temps: (num_heads,) f32.

    NOTE: CSRA's `lam` and `base_logit` (mean over spatial) are never used in
    this forward pass, so they are omitted.
    TODO(synk): for realistic CSRA shapes (C~2048, L up to 56*56) tile over L
    in the grid (online softmax) and mark a batch/L axis "parallel" for v7x's
    two TensorCores; unnecessary at these toy sizes.
    """
    B, C, H, W = x_nchw.shape
    L = H * W
    num_heads, N, Cw = w_conv.shape
    assert Cw == C
    M = num_heads * N

    x_bcl = x_nchw.reshape(B, C, L)                  # NCHW flatten — no transpose
    w_all = w_conv.reshape(M, C)                     # head-major rows
    t_rows = jnp.repeat(temps.astype(jnp.float32), N).reshape(1, M)

    kernel = functools.partial(_mha_csra_fused_kernel, num_heads=num_heads)
    return pl.pallas_call(
        kernel,
        out_shape=jax.ShapeDtypeStruct((B, N), jnp.float32),
        grid=(1,),
        in_specs=[
            pl.BlockSpec((B, C, L), lambda i: (0, 0, 0)),
            pl.BlockSpec((M, C), lambda i: (0, 0)),
            pl.BlockSpec((1, M), lambda i: (0, 0)),
        ],
        out_specs=pl.BlockSpec((B, N), lambda i: (0, 0)),
        compiler_params=pltpu.CompilerParams(
            dimension_semantics=("arbitrary",),
        ),
    )(x_bcl, w_all, t_rows)


def mha_reference(x_nchw, w_conv, temps):
    """Pure-JAX reference matching the PyTorch MHA/CSRA forward."""
    B, C, H, W = x_nchw.shape
    L = H * W
    x_bcl = x_nchw.reshape(B, C, L)
    logit = jnp.zeros((B, w_conv.shape[1]), jnp.float32)
    for i in range(w_conv.shape[0]):
        score = jnp.einsum('nc,bcl->bnl', w_conv[i], x_bcl)    # (B, N, L)
        T = float(temps[i])
        if T == 99.0:
            att = jnp.max(score, axis=2)
        else:
            soft = jax.nn.softmax(score * T, axis=2)
            att = jnp.sum(score * soft, axis=2)
        logit = logit + att
    return logit


if __name__ == "__main__":
    # Module config: MHA(num_heads=4, lam=0.1, input_dim=4, num_classes=8)
    num_heads = 4
    temp_list = [1.0, 2.0, 4.0, 99.0]        # MHA.temp_settings[4]
    input_dim = 4
    num_classes = 8
    B, H, W = 2, 16, 16

    key = jax.random.PRNGKey(0)
    kx, kw = jax.random.split(key)
    x = jax.random.normal(kx, (B, input_dim, H, W), jnp.float32)
    # nn.Conv2d(input_dim, num_classes, 1, bias=False) per head:
    # weight (num_classes, input_dim, 1, 1) -> (num_heads, num_classes, input_dim)
    w_conv = jax.random.normal(
        kw, (num_heads, num_classes, input_dim), jnp.float32) * 0.1
    temps = jnp.asarray(temp_list, jnp.float32)

    out = mha_forward(x, w_conv, temps)
    out = jax.block_until_ready(out)

    ref = mha_reference(x, w_conv, temps)
    assert out.shape == (B, num_classes)
    assert jnp.allclose(out, ref, atol=1e-4, rtol=1e-4), (out, ref)
    print("KERNEL_OK")
</pallas_src>

<mosaic_0001>
module attributes {stable_mosaic.version = 11 : i64} {
  func.func @_mha_csra_fused_kernel(%arg0: i32, %arg1: memref<2x4x256xf32, #tpu.memory_space<vmem>>, %arg2: memref<32x4xf32, #tpu.memory_space<vmem>>, %arg3: memref<1x32xf32, #tpu.memory_space<vmem>>, %arg4: memref<2x8xf32, #tpu.memory_space<vmem>>) attributes {dimension_semantics = [#tpu.dimension_semantics<arbitrary>], iteration_bounds = array<i64: 1>, scalar_prefetch = 0 : i64, scratch_operands = 0 : i64, tpu.core_type = #tpu.core_type<tc>, window_params = [{pipeline_mode = #tpu.pipeline_mode<synchronous>, transform_indices = @transform_0, window_bounds = array<i64: 2, 4, 256>}, {pipeline_mode = #tpu.pipeline_mode<synchronous>, transform_indices = @transform_1, window_bounds = array<i64: 32, 4>}, {pipeline_mode = #tpu.pipeline_mode<synchronous>, transform_indices = @transform_2, window_bounds = array<i64: 1, 32>}, {pipeline_mode = #tpu.pipeline_mode<synchronous>, transform_indices = @transform_3, window_bounds = array<i64: 2, 8>}]} {
    %c0 = arith.constant 0 : index
    %c0_0 = arith.constant 0 : index
    %c0_1 = arith.constant 0 : index
    %0 = vector.load %arg1[%c0, %c0_0, %c0_1] : memref<2x4x256xf32, #tpu.memory_space<vmem>>, vector<2x4x256xf32>
    %c0_2 = arith.constant 0 : index
    %c0_3 = arith.constant 0 : index
    %1 = vector.load %arg2[%c0_2, %c0_3] : memref<32x4xf32, #tpu.memory_space<vmem>>, vector<32x4xf32>
    %c0_4 = arith.constant 0 : index
    %c0_5 = arith.constant 0 : index
    %2 = vector.load %arg3[%c0_4, %c0_5] : memref<1x32xf32, #tpu.memory_space<vmem>>, vector<1x32xf32>
    %3 = vector.shape_cast %1 : vector<32x4xf32> to vector<1x32x4xf32>
    %4 = vector.shape_cast %3 : vector<1x32x4xf32> to vector<1x32x4xf32>
    %5 = vector.broadcast %4 : vector<1x32x4xf32> to vector<2x32x4xf32>
    "tpu.trace_start"() <{level = 10 : i32, message = "bmc,bcl->bml"}> : () -> ()
    %cst = arith.constant dense<0.000000e+00> : vector<2x32x256xf32>
    %6 = tpu.matmul %5, %0, %cst {dimension_numbers = #tpu.dot_dimension_numbers<[2], [1], [1], [2], [0, 0, 0, 1, 1, 2], [0], [0]>} : vector<2x32x4xf32>, vector<2x4x256xf32>, vector<2x32x256xf32> -> vector<2x32x256xf32>
    "tpu.trace_stop"() : () -> ()
    %cst_6 = arith.constant dense<0xFF800000> : vector<2x32xf32>
    %7 = vector.multi_reduction <maximumf>, %6, %cst_6 [2] : vector<2x32x256xf32> to vector<2x32xf32>
    %8 = vector.shape_cast %2 : vector<1x32xf32> to vector<1x32x1xf32>
    %9 = vector.broadcast %8 : vector<1x32x1xf32> to vector<2x32x256xf32>
    %10 = arith.mulf %6, %9 : vector<2x32x256xf32>
    %cst_7 = arith.constant dense<0xFF800000> : vector<2x32xf32>
    %11 = vector.multi_reduction <maximumf>, %10, %cst_7 [2] : vector<2x32x256xf32> to vector<2x32xf32>
    %12 = vector.shape_cast %11 : vector<2x32xf32> to vector<2x32x1xf32>
    %13 = vector.broadcast %12 : vector<2x32x1xf32> to vector<2x32x256xf32>
    %14 = arith.subf %10, %13 : vector<2x32x256xf32>
    %15 = math.exp %14 : vector<2x32x256xf32>
    %cst_8 = arith.constant dense<0.000000e+00> : vector<2x32xf32>
    %16 = vector.multi_reduction <add>, %15, %cst_8 [2] : vector<2x32x256xf32> to vector<2x32xf32>
    %17 = arith.mulf %6, %15 : vector<2x32x256xf32>
    %cst_9 = arith.constant dense<0.000000e+00> : vector<2x32xf32>
    %18 = vector.multi_reduction <add>, %17, %cst_9 [2] : vector<2x32x256xf32> to vector<2x32xf32>
    %19 = arith.divf %18, %16 : vector<2x32xf32>
    %cst_10 = arith.constant 9.900000e+01 : f32
    %20 = vector.broadcast %cst_10 : f32 to vector<1x32xf32>
    %21 = arith.cmpf oeq, %2, %20 : vector<1x32xf32>
    %22 = vector.shape_cast %21 : vector<1x32xi1> to vector<1x32xi1>
    %23 = vector.broadcast %22 : vector<1x32xi1> to vector<2x32xi1>
    %24 = arith.select %23, %7, %19 : vector<2x32xi1>, vector<2x32xf32>
    %25 = vector.extract_strided_slice %24 {offsets = [0, 0], sizes = [2, 8], strides = [1, 1]} : vector<2x32xf32> to vector<2x8xf32>
    %26 = vector.extract_strided_slice %24 {offsets = [0, 8], sizes = [2, 8], strides = [1, 1]} : vector<2x32xf32> to vector<2x8xf32>
    %27 = arith.addf %25, %26 : vector<2x8xf32>
    %28 = vector.extract_strided_slice %24 {offsets = [0, 16], sizes = [2, 8], strides = [1, 1]} : vector<2x32xf32> to vector<2x8xf32>
    %29 = arith.addf %27, %28 : vector<2x8xf32>
    %30 = vector.extract_strided_slice %24 {offsets = [0, 24], sizes = [2, 8], strides = [1, 1]} : vector<2x32xf32> to vector<2x8xf32>
    %31 = arith.addf %29, %30 : vector<2x8xf32>
    %c0_11 = arith.constant 0 : index
    %c0_12 = arith.constant 0 : index
    %32 = vector.load %arg4[%c0_11, %c0_12] : memref<2x8xf32, #tpu.memory_space<vmem>>, vector<2x8xf32>
    tpu.vector_store %arg4[%c0_11, %c0_12], %31 {strides = array<i32>} : memref<2x8xf32, #tpu.memory_space<vmem>>, vector<2x8xf32>,
    return
  }
  func.func @transform_0(%arg0: i32) -> (i32, i32, i32) {
    %c0_i32 = arith.constant 0 : i32
    %c0_i32_0 = arith.constant 0 : i32
    %c0_i32_1 = arith.constant 0 : i32
    %c0_i32_2 = arith.constant 0 : i32
    return %c0_i32, %c0_i32_0, %c0_i32_1 : i32, i32, i32
  }
  func.func @transform_1(%arg0: i32) -> (i32, i32) {
    %c0_i32 = arith.constant 0 : i32
    %c0_i32_0 = arith.constant 0 : i32
    %c0_i32_1 = arith.constant 0 : i32
    return %c0_i32, %c0_i32_0 : i32, i32
  }
  func.func @transform_2(%arg0: i32) -> (i32, i32) {
    %c0_i32 = arith.constant 0 : i32
    %c0_i32_0 = arith.constant 0 : i32
    %c0_i32_1 = arith.constant 0 : i32
    return %c0_i32, %c0_i32_0 : i32, i32
  }
  func.func @transform_3(%arg0: i32) -> (i32, i32) {
    %c0_i32 = arith.constant 0 : i32
    %c0_i32_0 = arith.constant 0 : i32
    %c0_i32_1 = arith.constant 0 : i32
    return %c0_i32, %c0_i32_0 : i32, i32
  }
}

</mosaic_0001>

<bundles_post_ra>
// kernel: tpu_custom_call.1
= control target key start
LH: loop header
LB: loop body
LE: loop exit
PB: predicated region body
PF: predicated region fallthrough
CT: control target
= control target key end

     0   :  { %vm37_vm0 = vcmask 1043456   ;;  %v250_v2 = vlaneseq  ;;  %v669_v5 = vmov 0.0   ;;  %vm24_vm1 = vcmask 31744   ;;  %s861_s0 = inlined_call_operand.vmem [shape: f32[2,4,256], index: 0, kind: input, shape index: {}]   ;;  %s862_s1 = inlined_call_operand.vmem [shape: f32[32,4], index: 1, kind: input, shape index: {}]   ;;  %s863_s2 = inlined_call_operand.vmem [shape: f32[1,32], index: 2, kind: input, shape index: {}]   ;;  %s864_s3 = inlined_call_operand.hbm [shape: f32[2,8], index: 3, kind: output, shape index: {}]  }
   0x1   :  { %v15_v0 = vld [vmem:[%s861_s0] sm:$0xff]  ;;  %v16_v1 = vld [vmem:[%s861_s0 + $0x8] sm:$0xff]  ;;  %106 = vmatprep.mubr.f32.mxu0 %v669_v5  ;;  %201 = vmatprep.mubr.f32.mxu1 %v669_v5 }
   0x2   :  { %v23_v3 = vcombine.high %v15_v0, %v15_v0  ;;  %v132_v4 = vcombine.high %v16_v1, %v16_v1  ;;  %v17_v6 = vld [vmem:[%s862_s1] sm:$0xff]  ;;  %v705_v7 = vshrl.u32 %v250_v2, 7 }
   0x3   :  { %8 = vsyncpa [#allocation3], 0  ;;  %v712_v8 = vld [vmem:[%s863_s2] sm:$0x1]  ;;  %v18_v10 = vld [vmem:[%s862_s1 + $0x8] sm:$0xff]  ;;  %vm463_vm3 = vcmask 130112  }
   0x4   :  { %579 = vmatprep.subr.msk.mxu0 %vm37_vm0, %v23_v3  ;;  %585 = vmatprep.subr.msk.mxu1 %vm37_vm0, %v132_v4  ;;  %v252_v9 = vsub.s32 0, %v705_v7  ;;  %v19_v12 = vld [vmem:[%s862_s1 + $0x10] sm:$0xff]  ;;  %v20_v13 = vld [vmem:[%s862_s1 + $0x18] sm:$0xff]  ;;  %vm437_vm2 = vcmp.eq.f32.partialorder %v712_v8, 99.0  ;;  %vm470_vm4 = vcmask 195712   ;;  %vm477_vm5 = vcmask 261312  }
   0x5   :  { %580 = vmatpush1.msk.msra.mxu0 %vm37_vm0, %v15_v0  ;;  %586 = vmatpush1.msk.msra.mxu1 %vm37_vm0, %v16_v1  ;;  %vm498_vm7 = vcmask 1041409   ;;  %s671_s1 = smov 112   ;;  %s672_s24 = smov 120   ;;  %vm563_vm8 = vcmask 58368  }
   0x6   :  { %581 = vmatmul.mubr.msk.f32.vlgmr.msra.gmra.mxu0 %vm24_vm1, %v17_v6  ;;  %587 = vmatmul.mubr.msk.f32.vlgmr.msra.gmra.mxu1 %vm24_vm1, %v17_v6  ;;  %v253_v11 = vrot.slane %v712_v8, %v252_v9  ;;  %s673_s25 = smov 104   ;;  %s674_s26 = smov [#allocation2]  }
   0x7   :  { %112 = vmatprep.mubr.f32.mxu0 %v669_v5  ;;  %207 = vmatprep.mubr.f32.mxu1 %v669_v5  ;;  %s571_s27 = sshll.u32 %s674_s26, 4  ;;  %s572_s27 = int_to_ptr.vmem [resolvable:$true] %s571_s27 }
   0x8   :  { %255 = vbcast.lane.b32.xlu0 %v253_v11, 256  ;;  %263 = vbcast.lane.b32.xlu1 %v253_v11, 272  ;;  %s647_s28 = scalar_lea.vmem %s572_s27, 32  ;;  %p652_p1 = scmp.lt.s32.totalorder %s572_s27, %s572_s27 }
   0x9   :  { %p648_p0 = scmp.ne.s32.totalorder %s572_s27, %s647_s28  ;;  %p653_p2 = scmp.lt.s32.totalorder %s647_s28, %s647_s28 }
   0xa   :  { %582 = vmatmul.mubr.msk.f32.gmra.mxu0 %vm24_vm1, %v18_v10  ;;  %588 = vmatmul.mubr.msk.f32.gmra.mxu1 %vm24_vm1, %v18_v10 }
   0xb   :  { %118 = vmatprep.mubr.f32.mxu0 %v669_v5  ;;  %213 = vmatprep.mubr.f32.mxu1 %v669_v5  ;;  %p654_p3 = por %p653_p2, %p652_p1 }
   0xc   :  { %259 = vbcast.lane.b32.xlu0 %v253_v11, 264  ;;  %267 = vbcast.lane.b32.xlu1 %v253_v11, 280 }
   0xd   :  { %p655_p4 = pnand %p654_p3, %p648_p0 }
   0xe   :  { %583 = vmatmul.mubr.msk.f32.gmra.mxu0 %vm24_vm1, %v19_v12  ;;  %589 = vmatmul.mubr.msk.f32.gmra.mxu1 %vm24_vm1, %v19_v12 }
   0xf   :  { %124 = vmatprep.mubr.f32.mxu0 %v669_v5  ;;  %219 = vmatprep.mubr.f32.mxu1 %v669_v5 }
  0x12   :  { %584 = vmatmul.mubr.msk.f32.gmra.mxu0 %vm24_vm1, %v20_v13  ;;  %590 = vmatmul.mubr.msk.f32.gmra.mxu1 %vm24_vm1, %v20_v13 }
  0x7a   :  { %v256_v14 = vpop.permute.xlu0 %255  ;;  %v264_v22 = vpop.permute.xlu1 %263 }
  0x7e   :  { %v260_v19 = vpop.permute.xlu0 %259  ;;  %v268_v36 = vpop.permute.xlu1 %267 }
  0xc6   :  { %v737_v15 = vpop.f32.mrf.mxu0  ;;  %v739_v16 = vpop.f32.mrf.mxu1 }
  0xc7   :  { %v269_v20 = vmul.f32 %v256_v14, %v737_v15  ;;  %v277_v25 = vmul.f32 %v256_v14, %v739_v16 }
  0xc8   :  { %v741_v17 = vpop.f32.mrf.mxu0  ;;  %v743_v18 = vpop.f32.mrf.mxu1 }
  0xc9   :  { %v270_v21 = vmul.f32 %v256_v14, %v741_v17  ;;  %v278_v26 = vmul.f32 %v256_v14, %v743_v18  ;;  %v226_v58 = vmax.f32 %v737_v15, %v741_v17 }
  0xca   :  { %v747_v23 = vpop.f32.mrf.mxu0  ;;  %v749_v24 = vpop.f32.mrf.mxu1 }
  0xcb   :  { %v285_v27 = vmax.f32 %v269_v20, %v270_v21  ;;  %v271_v30 = vmul.f32 %v260_v19, %v747_v23  ;;  %v297_v33 = vmax.f32 %v277_v25, %v278_v26  ;;  %v279_v37 = vmul.f32 %v260_v19, %v749_v24 }
  0xcc   :  { %v753_v28 = vpop.f32.mrf.mxu0  ;;  %v755_v29 = vpop.f32.mrf.mxu1 }
  0xcd   :  { %286 = vmax.xlane.f32.xlu0 %v285_v27  ;;  %v272_v31 = vmul.f32 %v260_v19, %v753_v28  ;;  %v280_v38 = vmul.f32 %v260_v19, %v755_v29  ;;  %v229_v59 = vmax.f32 %v747_v23, %v753_v28 }
  0xce   :  { %v759_v32 = vpop.f32.mrf.mxu0  ;;  %v761_v34 = vpop.f32.mrf.mxu1 }
  0xcf   :  { %v288_v35 = vmax.f32 %v271_v30, %v272_v31  ;;  %v273_v39 = vmul.f32 %v264_v22, %v759_v32  ;;  %v771_v42 = vmul.f32 %v264_v22, %v761_v34  ;;  %v300_v47 = vmax.f32 %v279_v37, %v280_v38 }
  0xd0   :  { %v766_v40 = vpop.f32.mrf.mxu0  ;;  %v768_v41 = vpop.f32.mrf.mxu1 }
  0xd1   :  { %298 = vmax.xlane.f32.xlu0 %v297_v33  ;;  %289 = vmax.xlane.f32.xlu1 %v288_v35  ;;  %v274_v43 = vmul.f32 %v264_v22, %v766_v40  ;;  %v775_v44 = vmul.f32 %v264_v22, %v768_v41 }
  0xd2   :  { %v777_v45 = vpop.f32.mrf.mxu0  ;;  %v779_v46 = vpop.f32.mrf.mxu1 }
  0xd3   :  { %v291_v48 = vmax.f32 %v273_v39, %v274_v43  ;;  %v782_v49 = vmul.f32 %v268_v36, %v777_v45  ;;  %v303_v52 = vmax.f32 %v771_v42, %v775_v44  ;;  %v797_v55 = vmul.f32 %v268_v36, %v779_v46 }
  0xd4   :  { %v784_v50 = vpop.f32.mrf.mxu0  ;;  %v786_v51 = vpop.f32.mrf.mxu1 }
  0xd5   :  { %v791_v53 = vmul.f32 %v268_v36, %v784_v50  ;;  %301 = vmax.xlane.f32.xlu0 %v300_v47  ;;  %292 = vmax.xlane.f32.xlu1 %v291_v48  ;;  %v794_v54 = vmul.f32 %v268_v36, %v786_v51 }
  0xd7   :  { %v294_v56 = vmax.f32 %v782_v49, %v791_v53  ;;  %v306_v57 = vmax.f32 %v797_v55, %v794_v54 }
  0xd9   :  { %304 = vmax.xlane.f32.xlu0 %v303_v52  ;;  %295 = vmax.xlane.f32.xlu1 %v294_v56 }
  0xdd   :  { %307 = vmax.xlane.f32.xlu0 %v306_v57  ;;  %227 = vmax.xlane.f32.xlu1 %v226_v58 }
  0xe1   :  { %230 = vmax.xlane.f32.xlu0 %v229_v59 }
 0x156   :  { %v287_v60 = vpop.xlane.xlu0 %286 }
 0x157   :  { %v309_v61 = vsub.f32 %v269_v20, %v287_v60  ;;  %v310_v62 = vsub.f32 %v270_v21, %v287_v60 }
 0x159   :  { %v325_v63 = vmul.f32 1.442695, %v309_v61  ;;  %v327_v0 = vmul.f32 1.442695, %v310_v62 }
 0x15a   :  { %v299_v1 = vpop.xlane.xlu0 %298  ;;  %v290_v3 = vpop.xlane.xlu1 %289 }
 0x15b   :  { %599 = vpow2.f32 %v325_v63  ;;  %v317_v4 = vsub.f32 %v277_v25, %v299_v1  ;;  %v318_v5 = vsub.f32 %v278_v26, %v299_v1  ;;  %v311_v6 = vsub.f32 %v271_v30, %v290_v3 }
 0x15c   :  { %601 = vpow2.f32 %v327_v0  ;;  %v312_v10 = vsub.f32 %v272_v31, %v290_v3 }
 0x15d   :  { %v341_v11 = vmul.f32 1.442695, %v317_v4  ;;  %v343_v12 = vmul.f32 1.442695, %v318_v5  ;;  %v329_v13 = vmul.f32 1.442695, %v311_v6 }
 0x15e   :  { %v331_v14 = vmul.f32 1.442695, %v312_v10  ;;  %v302_v19 = vpop.xlane.xlu0 %301  ;;  %v293_v22 = vpop.xlane.xlu1 %292 }
 0x15f   :  { %603 = vpow2.f32 %v341_v11  ;;  %v319_v27 = vsub.f32 %v279_v37, %v302_v19  ;;  %v320_v20 = vsub.f32 %v280_v38, %v302_v19  ;;  %v313_v35 = vsub.f32 %v273_v39, %v293_v22 }
 0x160   :  { %605 = vpow2.f32 %v343_v12  ;;  %v314_v25 = vsub.f32 %v274_v43, %v293_v22 }
 0x161   :  { %607 = vpow2.f32 %v329_v13  ;;  %v345_v21 = vmul.f32 1.442695, %v319_v27  ;;  %v347_v33 = vmul.f32 1.442695, %v320_v20  ;;  %v333_v30 = vmul.f32 1.442695, %v313_v35 }
 0x162   :  { %609 = vpow2.f32 %v331_v14  ;;  %v305_v26 = vpop.xlane.xlu0 %304  ;;  %v296_v31 = vpop.xlane.xlu1 %295  ;;  %v335_v36 = vmul.f32 1.442695, %v314_v25 }
 0x163   :  { %611 = vpow2.f32 %v345_v21  ;;  %v321_v47 = vsub.f32 %v771_v42, %v305_v26  ;;  %v322_v48 = vsub.f32 %v775_v44, %v305_v26  ;;  %v315_v37 = vsub.f32 %v782_v49, %v296_v31 }
 0x164   :  { %613 = vpow2.f32 %v347_v33  ;;  %v316_v56 = vsub.f32 %v791_v53, %v296_v31 }
 0x165   :  { %615 = vpow2.f32 %v333_v30  ;;  %v349_v39 = vmul.f32 1.442695, %v321_v47  ;;  %v351_v57 = vmul.f32 1.442695, %v322_v48  ;;  %v337_v59 = vmul.f32 1.442695, %v315_v37 }
 0x166   :  { %617 = vpow2.f32 %v335_v36  ;;  %v308_v60 = vpop.xlane.xlu0 %307  ;;  %v339_v62 = vmul.f32 1.442695, %v316_v56 }
 0x167   :  { %619 = vpow2.f32 %v349_v39  ;;  %v323_v53 = vsub.f32 %v797_v55, %v308_v60  ;;  %v324_v3 = vsub.f32 %v794_v54, %v308_v60  ;;  %v238_v39 = vmax.f32 %v739_v16, %v743_v18 }
 0x168   :  { %v600_v52 = vpop.eup %599  ;;  %621 = vpow2.f32 %v351_v57  ;;  %v232_v57 = vmax.f32 %v759_v32, %v766_v40  ;;  %v241_v60 = vmax.f32 %v749_v24, %v755_v29 }
 0x169   :  { %v602_v38 = vpop.eup %601  ;;  %v381_v63 = vmul.f32 %v600_v52, %v737_v15  ;;  %623 = vpow2.f32 %v337_v59  ;;  %v355_v12 = vmul.f32 1.442695, %v324_v3 }
 0x16a   :  { %v357_v43 = vadd.f32 %v602_v38, %v600_v52  ;;  %v382_v49 = vmul.f32 %v602_v38, %v741_v17  ;;  %625 = vpow2.f32 %v339_v62  ;;  %v353_v17 = vmul.f32 1.442695, %v323_v53 }
 0x16b   :  { %v244_v62 = vmax.f32 %v761_v34, %v768_v41 }
 0x16c   :  { %v604_v58 = vpop.eup %603  ;;  %358 = vadd.xlane.f32.xlu1 %v357_v43  ;;  %v397_v10 = vadd.f32 %v382_v49, %v381_v63  ;;  %627 = vpow2.f32 %v353_v17 }
 0x16d   :  { %v606_v61 = vpop.eup %605  ;;  %v389_v11 = vmul.f32 %v604_v58, %v739_v16  ;;  %629 = vpow2.f32 %v355_v12 }
 0x16e   :  { %v608_v42 = vpop.eup %607  ;;  %v369_v44 = vadd.f32 %v606_v61, %v604_v58  ;;  %v390_v15 = vmul.f32 %v606_v61, %v743_v18 }
 0x16f   :  { %v610_v0 = vpop.eup %609  ;;  %v383_v55 = vmul.f32 %v608_v42, %v747_v23 }
 0x170   :  { %v612_v1 = vpop.eup %611  ;;  %v360_v4 = vadd.f32 %v610_v0, %v608_v42  ;;  %370 = vadd.xlane.f32.xlu1 %v369_v44  ;;  %v384_v13 = vmul.f32 %v610_v0, %v753_v28  ;;  %v409_v54 = vadd.f32 %v390_v15, %v389_v11  ;;  %v231_v44 = vpop.xlane.xlu0 %230 }
 0x171   :  { %v614_v5 = vpop.eup %613  ;;  %v391_v27 = vmul.f32 %v612_v1, %v749_v24  ;;  %v247_v24 = vmax.f32 %v779_v46, %v786_v51 }
 0x172   :  { %361 = vadd.xlane.f32.xlu0 %v360_v4  ;;  %v372_v6 = vadd.f32 %v614_v5, %v612_v1  ;;  %v616_v14 = vpop.eup %615  ;;  %v400_v22 = vadd.f32 %v384_v13, %v383_v55  ;;  %v392_v20 = vmul.f32 %v614_v5, %v755_v29  ;;  %v228_v29 = vpop.xlane.xlu1 %227  ;;  %v453_v4 = vand.u32 127, %v250_v2 }
 0x173   :  { %v618_v19 = vpop.eup %617  ;;  %v385_v33 = vmul.f32 %v616_v14, %v759_v32  ;;  %v235_v32 = vmax.f32 %v777_v45, %v784_v50 }
 0x174   :  { %398 = vadd.xlane.f32.xlu1 %v397_v10  ;;  %v363_v21 = vadd.f32 %v618_v19, %v616_v14  ;;  %v386_v23 = vmul.f32 %v618_v19, %v766_v40  ;;  %v620_v35 = vpop.eup %619  ;;  %v412_v25 = vadd.f32 %v392_v20, %v391_v27  ;;  %v456_v19 = vsub.s32 %v453_v4, %v705_v7 }
 0x175   :  { %v622_v28 = vpop.eup %621  ;;  %v393_v47 = vmul.f32 %v620_v35, %v761_v34  ;;  %v472_v20 = vadd.s32 4294967272, %v453_v4 }
 0x176   :  { %373 = vadd.xlane.f32.xlu0 %v372_v6  ;;  %v624_v26 = vpop.eup %623  ;;  %v403_v31 = vadd.f32 %v386_v23, %v385_v33  ;;  %v375_v36 = vadd.f32 %v622_v28, %v620_v35  ;;  %v394_v48 = vmul.f32 %v622_v28, %v768_v41  ;;  %v458_v6 = vadd.s32 4294967288, %v453_v4 }
 0x177   :  { %v626_v30 = vpop.eup %625  ;;  %v387_v58 = vmul.f32 %v624_v26, %v777_v45 }
 0x178   :  { %410 = vadd.xlane.f32.xlu1 %v409_v54  ;;  %v366_v52 = vadd.f32 %v626_v30, %v624_v26  ;;  %v415_v38 = vadd.f32 %v394_v48, %v393_v47  ;;  %v388_v59 = vmul.f32 %v626_v30, %v784_v50  ;;  %v461_v55 = vsub.s32 %v458_v6, %v705_v7 }
 0x179   :  { %v628_v37 = vpop.eup %627  ;;  %v670_v30 = vmov 0  }
 0x17a   :  { %401 = vadd.xlane.f32.xlu0 %v400_v22  ;;  %v630_v56 = vpop.eup %629  ;;  %v406_v61 = vadd.f32 %v388_v59, %v387_v58  ;;  %v395_v16 = vmul.f32 %v628_v37, %v779_v46  ;;  %v465_v22 = vadd.s32 4294967280, %v453_v4  ;;  %v462_v33 = vrot.slane %v231_v44, %v461_v55 }
 0x17b   :  { %v378_v43 = vadd.f32 %v630_v56, %v628_v37  ;;  %v396_v18 = vmul.f32 %v630_v56, %v786_v51  ;;  %v475_v37 = vsub.s32 %v472_v20, %v705_v7 }
 0x17c   :  { %364 = vadd.xlane.f32.xlu1 %v363_v21  ;;  %v468_v47 = vsub.s32 %v465_v22, %v705_v7 }
 0x17d   :  { %v418_v40 = vadd.f32 %v396_v18, %v395_v16 }
 0x17e   :  { %413 = vadd.xlane.f32.xlu0 %v412_v25 }
 0x180   :  { %404 = vadd.xlane.f32.xlu1 %v403_v31  ;;  %v438_v31 = vsel %vm437_vm2, 1, %v670_v30 }
 0x182   :  { %376 = vadd.xlane.f32.xlu0 %v375_v36  ;;  %v457_v36 = vrot.slane %v228_v29, %v456_v19 }
 0x184   :  { %367 = vadd.xlane.f32.xlu1 %v366_v52 }
 0x186   :  { %416 = vadd.xlane.f32.xlu0 %v415_v38  ;;  %v464_v38 = vsel %vm463_vm3, %v462_v33, %v457_v36 }
 0x188   :  { %239 = vmax.xlane.f32.xlu1 %v238_v39 }
 0x18a   :  { %379 = vadd.xlane.f32.xlu0 %v378_v43 }
 0x18c   :  { %233 = vmax.xlane.f32.xlu1 %v232_v57  ;;  %v442_v57 = vrot.slane %v438_v31, %v252_v9 }
 0x18e   :  { %242 = vmax.xlane.f32.xlu0 %v241_v60  ;;  %vm443_vm6 = vcmp.eq.s32.totalorder %v442_v57, 1 }
 0x190   :  { %407 = vadd.xlane.f32.xlu1 %v406_v61 }
 0x192   :  { %245 = vmax.xlane.f32.xlu0 %v244_v62 }
 0x194   :  { %236 = vmax.xlane.f32.xlu1 %v235_v32 }
 0x196   :  { %419 = vadd.xlane.f32.xlu0 %v418_v40 }
 0x19a   :  { %248 = vmax.xlane.f32.xlu0 %v247_v24 }
 0x1f5   :  { %v359_v42 = vpop.xlane.xlu1 %358 }
 0x1f6   :  { %631 = vrcp.f32 %v359_v42 }
 0x1f9   :  { %v371_v34 = vpop.xlane.xlu1 %370 }
 0x1fa   :  { %633 = vrcp.f32 %v371_v34 }
 0x1fb   :  { %v362_v41 = vpop.xlane.xlu0 %361 }
 0x1fc   :  { %635 = vrcp.f32 %v362_v41 }
 0x1fd   :  { %v399_v63 = vpop.xlane.xlu1 %398 }
 0x1ff   :  { %v374_v49 = vpop.xlane.xlu0 %373 }
 0x200   :  { %637 = vrcp.f32 %v374_v49 }
 0x201   :  { %v411_v0 = vpop.xlane.xlu1 %410 }
 0x203   :  { %v402_v53 = vpop.xlane.xlu0 %401  ;;  %v632_v11 = vpop.eup %631 }
 0x204   :  { %v422_v28 = vmul.f32 %v632_v11, %v399_v63 }
 0x205   :  { %v365_v1 = vpop.xlane.xlu1 %364 }
 0x206   :  { %639 = vrcp.f32 %v365_v1  ;;  %v512_v58 = vrot.slane %v422_v28, %v456_v19 }
 0x207   :  { %v414_v3 = vpop.xlane.xlu0 %413  ;;  %v634_v17 = vpop.eup %633 }
 0x208   :  { %v430_v25 = vmul.f32 %v634_v17, %v411_v0 }
 0x209   :  { %v405_v45 = vpop.xlane.xlu1 %404  ;;  %v636_v12 = vpop.eup %635 }
 0x20a   :  { %v424_v23 = vmul.f32 %v636_v12, %v402_v53  ;;  %v531_v59 = vrot.slane %v430_v25, %v456_v19 }
 0x20b   :  { %v377_v50 = vpop.xlane.xlu0 %376 }
 0x20c   :  { %641 = vrcp.f32 %v377_v50  ;;  %v516_v56 = vrot.slane %v424_v23, %v461_v55 }
 0x20d   :  { %v368_v46 = vpop.xlane.xlu1 %367  ;;  %v638_v14 = vpop.eup %637 }
 0x20e   :  { %643 = vrcp.f32 %v368_v46  ;;  %v432_v26 = vmul.f32 %v638_v14, %v414_v3  ;;  %v517_v34 = vsel %vm463_vm3, %v516_v56, %v512_v58 }
 0x20f   :  { %v417_v51 = vpop.xlane.xlu0 %416 }
 0x210   :  { %v535_v60 = vrot.slane %v432_v26, %v461_v55 }
 0x211   :  { %v240_v5 = vpop.xlane.xlu1 %239 }
 0x212   :  { %v482_v24 = vrot.slane %v240_v5, %v456_v19  ;;  %v536_v7 = vsel %vm463_vm3, %v535_v60, %v531_v59 }
 0x213   :  { %v380_v10 = vpop.xlane.xlu0 %379  ;;  %v640_v54 = vpop.eup %639 }
 0x214   :  { %645 = vrcp.f32 %v380_v10  ;;  %v426_v48 = vmul.f32 %v640_v54, %v405_v45 }
 0x215   :  { %v234_v15 = vpop.xlane.xlu1 %233 }
 0x216   :  { %v521_v16 = vrot.slane %v426_v48, %v468_v47  ;;  %v469_v32 = vrot.slane %v234_v15, %v468_v47 }
 0x217   :  { %v243_v13 = vpop.xlane.xlu0 %242 }
 0x218   :  { %v486_v61 = vrot.slane %v243_v13, %v461_v55  ;;  %v522_v0 = vsel %vm470_vm4, %v521_v16, %v517_v34  ;;  %v471_v1 = vsel %vm470_vm4, %v469_v32, %v464_v38 }
 0x219   :  { %v408_v27 = vpop.xlane.xlu1 %407  ;;  %v642_v2 = vpop.eup %641 }
 0x21a   :  { %v434_v52 = vmul.f32 %v642_v2, %v417_v51  ;;  %v487_v9 = vsel %vm463_vm3, %v486_v61, %v482_v24 }
 0x21b   :  { %v644_v21 = vpop.eup %643  ;;  %v246_v35 = vpop.xlane.xlu0 %245 }
 0x21c   :  { %v428_v8 = vmul.f32 %v644_v21, %v408_v27  ;;  %v540_v18 = vrot.slane %v434_v52, %v468_v47  ;;  %v491_v40 = vrot.slane %v246_v35, %v468_v47 }
 0x21d   :  { %v237_v43 = vpop.xlane.xlu1 %236 }
 0x21e   :  { %v526_v29 = vrot.slane %v428_v8, %v475_v37  ;;  %v476_v44 = vrot.slane %v237_v43, %v475_v37  ;;  %v541_v53 = vsel %vm470_vm4, %v540_v18, %v536_v7  ;;  %v492_v3 = vsel %vm470_vm4, %v491_v40, %v487_v9 }
 0x21f   :  { %v420_v39 = vpop.xlane.xlu0 %419 }
 0x220   :  { %v527_v45 = vsel %vm477_vm5, %v526_v29, %v522_v0  ;;  %v478_v46 = vsel %vm477_vm5, %v476_v44, %v471_v1 }
 0x221   :  { %v646_v62 = vpop.eup %645 }
 0x222   :  { %v436_v42 = vmul.f32 %v646_v62, %v420_v39 }
 0x223   :  { %v249_v41 = vpop.xlane.xlu0 %248 }
 0x224   :  { %v545_v63 = vrot.slane %v436_v42, %v475_v37  ;;  %v496_v49 = vrot.slane %v249_v41, %v475_v37 }
 0x226   :  { %v546_v50 = vsel %vm477_vm5, %v545_v63, %v541_v53  ;;  %v497_v51 = vsel %vm477_vm5, %v496_v49, %v492_v3 }
 0x227   :  { %v499_v4 = vsel %vm498_vm7, %v497_v51, %v478_v46  ;;  %v547_v5 = vsel %vm498_vm7, %v546_v50, %v527_v45 }
 0x228   :  { %v549_v6 = vsel %vm443_vm6, %v499_v4, %v547_v5 }
 0x229   :  { %555 = vrot.lane.b32.xlu0 %v549_v6, %s671_s1  ;;  %551 = vrot.lane.b32.xlu1 %v549_v6, %s672_s24 }
 0x22d   :  { %559 = vrot.lane.b32.xlu1 %v549_v6, %s673_s25 }
 0x29b   :  { %v552_v10 = vpop.permute.xlu1 %551  ;;  %v556_v15 = vpop.permute.xlu0 %555 }
 0x29c   :  { %v554_v11 = vadd.f32 %v552_v10, %v549_v6 }
 0x29e   :  { %v558_v17 = vadd.f32 %v556_v15, %v554_v11 }
 0x29f   :  { %v560_v12 = vpop.permute.xlu1 %559 }
 0x2a0   :  { %v562_v55 = vadd.f32 %v560_v12, %v558_v17 }
 0x2a2   :  { %564 = vst.msk [vmem:[#allocation2] sm:$0x3] %vm563_vm8, %v562_v55 }
 0x2a3   :  { %658 = shalt.err (!%p655_p4)
}
 0x2a4   :  { %574 = dma.vmem_to_hbm [thread:$0]  %s572_s27, 32, %s864_s3, [#allocation3]  }
 0x2a5   :  { %667 = dma.done.wait [#allocation3], 32  }
 0x2a6   :  { %668 = vsyncadd [#allocation3], 4294967264 }
 0x2a7   :  { %578 = vsyncpa [#allocation3], 1 }

</bundles_post_ra>
